<compile_context>
chip_gen: v7x
topology: tpu7x:2x2x1
jax: 0.10.0
libtpu: 0.0.40
codegen_flags: <defaults>
</compile_context>

<pallas_src>
import math

import jax
import jax.numpy as jnp
from jax.experimental import pallas as pl
from jax.experimental.pallas import tpu as pltpu


def conv1d_ncl_kernel(x_ref, w_ref, b_ref, o_ref):
    """Direct Conv1d (stride=1, no padding), NCL layout, VPU shift-FMA form.

    x_ref: (C_in, L)           one batch element, L on lanes
    w_ref: (C_out, C_in * K)   weights, column index = c_in * K + k
    b_ref: (C_out, 1)          bias
    o_ref: (C_out, L_out)      one batch element of output, L_out on lanes
    """
    C_in, L = x_ref.shape
    C_out, L_out = o_ref.shape
    K = L - L_out + 1                       # static Python int (3)

    x = x_ref[...]                          # (C_in, L): single load, all taps slice it
    w = w_ref[...]                          # (C_out, C_in*K)

    # Seed the accumulator with the bias (saves a separate add at the end).
    acc = jnp.broadcast_to(b_ref[...], (C_out, L_out)).astype(jnp.float32)

    # K*C_in = 12 rank-1 broadcast FMAs, fully unrolled (static Python loops):
    #   acc[c_out, l] += w[c_out, c_in, k] * x[c_in, l + k]
    # (C_out,1) lane-broadcast times (1,L_out) sublane-broadcast -> VPU work;
    # the k lane-shift is XLU work (free slot relative to VALU).
    for c in range(C_in):
        for k in range(K):
            idx = c * K + k
            w_col = w[:, idx:idx + 1]         # (C_out, 1)
            x_row = x[c:c + 1, k:k + L_out]   # (1, L_out), k-shifted input row
            acc = acc + w_col * x_row         # (C_out, L_out)

    o_ref[...] = acc.astype(o_ref.dtype)      # lane-dense store (L_out on lanes)


def conv1d_pallas(x_ncl, weight, bias):
    """PyTorch-semantics Conv1d forward with no wrapper transposes.

    x_ncl:  (N, C_in, L)      float32
    weight: (C_out, C_in, K)  float32  (PyTorch layout)
    bias:   (C_out,)          float32
    returns (N, C_out, L_out) with L_out = L - K + 1
    """
    N, C_in, L = x_ncl.shape
    C_out, _, K = weight.shape
    L_out = L - K + 1

    # Pure metadata reshapes on contiguous memory (no transposes, no copies).
    w2 = weight.reshape(C_out, C_in * K)      # column = c_in * K + k
    b2 = bias.reshape(C_out, 1)

    return pl.pallas_call(
        conv1d_ncl_kernel,
        out_shape=jax.ShapeDtypeStruct((N, C_out, L_out), x_ncl.dtype),
        grid=(N,),
        in_specs=[
            # One batch element per grid step; batch dim squeezed out of the ref.
            pl.BlockSpec((None, C_in, L), lambda n: (n, 0, 0)),
            # Weights / bias: constant block index -> stay resident in VMEM.
            pl.BlockSpec((C_out, C_in * K), lambda n: (0, 0)),
            pl.BlockSpec((C_out, 1), lambda n: (0, 0)),
        ],
        out_specs=pl.BlockSpec((None, C_out, L_out), lambda n: (n, 0, 0)),
        compiler_params=pltpu.CompilerParams(
            # Batch axis is independent -> shard across v7x's 2 TCs; free on v5e/v6e.
            dimension_semantics=("parallel",),
        ),
    )(x_ncl, w2, b2)


def init_conv1d_params(key, c_in, c_out, k):
    """Deterministic init mirroring PyTorch Conv1d default (kaiming-uniform)."""
    kw, kb = jax.random.split(key)
    fan_in = c_in * k
    bound_w = math.sqrt(1.0 / fan_in) * math.sqrt(3.0)   # kaiming_uniform a=sqrt(5)
    bound_b = 1.0 / math.sqrt(fan_in)
    weight = jax.random.uniform(kw, (c_out, c_in, k), jnp.float32,
                                minval=-bound_w, maxval=bound_w)
    bias = jax.random.uniform(kb, (c_out,), jnp.float32,
                              minval=-bound_b, maxval=bound_b)
    return weight, bias


if __name__ == "__main__":
    key = jax.random.PRNGKey(0)
    k_x, k_p = jax.random.split(key)

    N, C_IN, L = 2, 4, 16            # input consistent with Conv1d(4, 16, 3)
    C_OUT, K = 16, 3

    x = jax.random.normal(k_x, (N, C_IN, L), jnp.float32)
    weight, bias = init_conv1d_params(k_p, C_IN, C_OUT, K)

    out = conv1d_pallas(x, weight, bias)
    out = jax.block_until_ready(out)

    # Reference check (plain JAX conv, same semantics as torch.nn.Conv1d).
    ref = jax.lax.conv_general_dilated(
        x, weight, window_strides=(1,), padding="VALID",
        dimension_numbers=("NCH", "OIH", "NCH"),
    ) + bias[None, :, None]
    assert out.shape == (N, C_OUT, L - K + 1)
    assert jnp.allclose(out, ref, atol=1e-5, rtol=1e-5)

    print("KERNEL_OK")
</pallas_src>

<mosaic_0001>
module attributes {stable_mosaic.version = 11 : i64} {
  func.func @conv1d_ncl_kernel(%arg0: i32, %arg1: memref<1x4x16xf32, #tpu.memory_space<vmem>>, %arg2: memref<16x12xf32, #tpu.memory_space<vmem>>, %arg3: memref<16x1xf32, #tpu.memory_space<vmem>>, %arg4: memref<1x16x14xf32, #tpu.memory_space<vmem>>) attributes {dimension_semantics = [#tpu.dimension_semantics<parallel>], iteration_bounds = array<i64: 2>, scalar_prefetch = 0 : i64, scratch_operands = 0 : i64, tpu.core_type = #tpu.core_type<tc>, window_params = [{transform_indices = @transform_0, window_bounds = array<i64: 1, 4, 16>}, {pipeline_mode = #tpu.pipeline_mode<synchronous>, transform_indices = @transform_1, window_bounds = array<i64: 16, 12>}, {pipeline_mode = #tpu.pipeline_mode<synchronous>, transform_indices = @transform_2, window_bounds = array<i64: 16, 1>}, {transform_indices = @transform_3, window_bounds = array<i64: 1, 16, 14>}]} {
    %c0 = arith.constant 0 : index
    %c0_0 = arith.constant 0 : index
    %c0_1 = arith.constant 0 : index
    %0 = vector.load %arg1[%c0, %c0_0, %c0_1] : memref<1x4x16xf32, #tpu.memory_space<vmem>>, vector<1x4x16xf32>
    %1 = vector.shape_cast %0 : vector<1x4x16xf32> to vector<4x16xf32>
    %c0_2 = arith.constant 0 : index
    %c0_3 = arith.constant 0 : index
    %2 = vector.load %arg2[%c0_2, %c0_3] : memref<16x12xf32, #tpu.memory_space<vmem>>, vector<16x12xf32>
    %c0_4 = arith.constant 0 : index
    %c0_5 = arith.constant 0 : index
    %3 = vector.load %arg3[%c0_4, %c0_5] : memref<16x1xf32, #tpu.memory_space<vmem>>, vector<16x1xf32>
    %4 = vector.shape_cast %3 : vector<16x1xf32> to vector<16x1xf32>
    %5 = vector.broadcast %4 : vector<16x1xf32> to vector<16x14xf32>
    %6 = vector.extract_strided_slice %2 {offsets = [0, 0], sizes = [16, 1], strides = [1, 1]} : vector<16x12xf32> to vector<16x1xf32>
    %7 = vector.extract_strided_slice %1 {offsets = [0, 0], sizes = [1, 14], strides = [1, 1]} : vector<4x16xf32> to vector<1x14xf32>
    %8 = vector.broadcast %6 : vector<16x1xf32> to vector<16x14xf32>
    %9 = vector.broadcast %7 : vector<1x14xf32> to vector<16x14xf32>
    %10 = arith.mulf %8, %9 : vector<16x14xf32>
    %11 = arith.addf %5, %10 : vector<16x14xf32>
    %12 = vector.extract_strided_slice %2 {offsets = [0, 1], sizes = [16, 1], strides = [1, 1]} : vector<16x12xf32> to vector<16x1xf32>
    %13 = vector.extract_strided_slice %1 {offsets = [0, 1], sizes = [1, 14], strides = [1, 1]} : vector<4x16xf32> to vector<1x14xf32>
    %14 = vector.broadcast %12 : vector<16x1xf32> to vector<16x14xf32>
    %15 = vector.broadcast %13 : vector<1x14xf32> to vector<16x14xf32>
    %16 = arith.mulf %14, %15 : vector<16x14xf32>
    %17 = arith.addf %11, %16 : vector<16x14xf32>
    %18 = vector.extract_strided_slice %2 {offsets = [0, 2], sizes = [16, 1], strides = [1, 1]} : vector<16x12xf32> to vector<16x1xf32>
    %19 = vector.extract_strided_slice %1 {offsets = [0, 2], sizes = [1, 14], strides = [1, 1]} : vector<4x16xf32> to vector<1x14xf32>
    %20 = vector.broadcast %18 : vector<16x1xf32> to vector<16x14xf32>
    %21 = vector.broadcast %19 : vector<1x14xf32> to vector<16x14xf32>
    %22 = arith.mulf %20, %21 : vector<16x14xf32>
    %23 = arith.addf %17, %22 : vector<16x14xf32>
    %24 = vector.extract_strided_slice %2 {offsets = [0, 3], sizes = [16, 1], strides = [1, 1]} : vector<16x12xf32> to vector<16x1xf32>
    %25 = vector.extract_strided_slice %1 {offsets = [1, 0], sizes = [1, 14], strides = [1, 1]} : vector<4x16xf32> to vector<1x14xf32>
    %26 = vector.broadcast %24 : vector<16x1xf32> to vector<16x14xf32>
    %27 = vector.broadcast %25 : vector<1x14xf32> to vector<16x14xf32>
    %28 = arith.mulf %26, %27 : vector<16x14xf32>
    %29 = arith.addf %23, %28 : vector<16x14xf32>
    %30 = vector.extract_strided_slice %2 {offsets = [0, 4], sizes = [16, 1], strides = [1, 1]} : vector<16x12xf32> to vector<16x1xf32>
    %31 = vector.extract_strided_slice %1 {offsets = [1, 1], sizes = [1, 14], strides = [1, 1]} : vector<4x16xf32> to vector<1x14xf32>
    %32 = vector.broadcast %30 : vector<16x1xf32> to vector<16x14xf32>
    %33 = vector.broadcast %31 : vector<1x14xf32> to vector<16x14xf32>
    %34 = arith.mulf %32, %33 : vector<16x14xf32>
    %35 = arith.addf %29, %34 : vector<16x14xf32>
    %36 = vector.extract_strided_slice %2 {offsets = [0, 5], sizes = [16, 1], strides = [1, 1]} : vector<16x12xf32> to vector<16x1xf32>
    %37 = vector.extract_strided_slice %1 {offsets = [1, 2], sizes = [1, 14], strides = [1, 1]} : vector<4x16xf32> to vector<1x14xf32>
    %38 = vector.broadcast %36 : vector<16x1xf32> to vector<16x14xf32>
    %39 = vector.broadcast %37 : vector<1x14xf32> to vector<16x14xf32>
    %40 = arith.mulf %38, %39 : vector<16x14xf32>
    %41 = arith.addf %35, %40 : vector<16x14xf32>
    %42 = vector.extract_strided_slice %2 {offsets = [0, 6], sizes = [16, 1], strides = [1, 1]} : vector<16x12xf32> to vector<16x1xf32>
    %43 = vector.extract_strided_slice %1 {offsets = [2, 0], sizes = [1, 14], strides = [1, 1]} : vector<4x16xf32> to vector<1x14xf32>
    %44 = vector.broadcast %42 : vector<16x1xf32> to vector<16x14xf32>
    %45 = vector.broadcast %43 : vector<1x14xf32> to vector<16x14xf32>
    %46 = arith.mulf %44, %45 : vector<16x14xf32>
    %47 = arith.addf %41, %46 : vector<16x14xf32>
    %48 = vector.extract_strided_slice %2 {offsets = [0, 7], sizes = [16, 1], strides = [1, 1]} : vector<16x12xf32> to vector<16x1xf32>
    %49 = vector.extract_strided_slice %1 {offsets = [2, 1], sizes = [1, 14], strides = [1, 1]} : vector<4x16xf32> to vector<1x14xf32>
    %50 = vector.broadcast %48 : vector<16x1xf32> to vector<16x14xf32>
    %51 = vector.broadcast %49 : vector<1x14xf32> to vector<16x14xf32>
    %52 = arith.mulf %50, %51 : vector<16x14xf32>
    %53 = arith.addf %47, %52 : vector<16x14xf32>
    %54 = vector.extract_strided_slice %2 {offsets = [0, 8], sizes = [16, 1], strides = [1, 1]} : vector<16x12xf32> to vector<16x1xf32>
    %55 = vector.extract_strided_slice %1 {offsets = [2, 2], sizes = [1, 14], strides = [1, 1]} : vector<4x16xf32> to vector<1x14xf32>
    %56 = vector.broadcast %54 : vector<16x1xf32> to vector<16x14xf32>
    %57 = vector.broadcast %55 : vector<1x14xf32> to vector<16x14xf32>
    %58 = arith.mulf %56, %57 : vector<16x14xf32>
    %59 = arith.addf %53, %58 : vector<16x14xf32>
    %60 = vector.extract_strided_slice %2 {offsets = [0, 9], sizes = [16, 1], strides = [1, 1]} : vector<16x12xf32> to vector<16x1xf32>
    %61 = vector.extract_strided_slice %1 {offsets = [3, 0], sizes = [1, 14], strides = [1, 1]} : vector<4x16xf32> to vector<1x14xf32>
    %62 = vector.broadcast %60 : vector<16x1xf32> to vector<16x14xf32>
    %63 = vector.broadcast %61 : vector<1x14xf32> to vector<16x14xf32>
    %64 = arith.mulf %62, %63 : vector<16x14xf32>
    %65 = arith.addf %59, %64 : vector<16x14xf32>
    %66 = vector.extract_strided_slice %2 {offsets = [0, 10], sizes = [16, 1], strides = [1, 1]} : vector<16x12xf32> to vector<16x1xf32>
    %67 = vector.extract_strided_slice %1 {offsets = [3, 1], sizes = [1, 14], strides = [1, 1]} : vector<4x16xf32> to vector<1x14xf32>
    %68 = vector.broadcast %66 : vector<16x1xf32> to vector<16x14xf32>
    %69 = vector.broadcast %67 : vector<1x14xf32> to vector<16x14xf32>
    %70 = arith.mulf %68, %69 : vector<16x14xf32>
    %71 = arith.addf %65, %70 : vector<16x14xf32>
    %72 = vector.extract_strided_slice %2 {offsets = [0, 11], sizes = [16, 1], strides = [1, 1]} : vector<16x12xf32> to vector<16x1xf32>
    %73 = vector.extract_strided_slice %1 {offsets = [3, 2], sizes = [1, 14], strides = [1, 1]} : vector<4x16xf32> to vector<1x14xf32>
    %74 = vector.broadcast %72 : vector<16x1xf32> to vector<16x14xf32>
    %75 = vector.broadcast %73 : vector<1x14xf32> to vector<16x14xf32>
    %76 = arith.mulf %74, %75 : vector<16x14xf32>
    %77 = arith.addf %71, %76 : vector<16x14xf32>
    %c0_6 = arith.constant 0 : index
    %c0_7 = arith.constant 0 : index
    %c0_8 = arith.constant 0 : index
    %78 = vector.load %arg4[%c0_6, %c0_7, %c0_8] : memref<1x16x14xf32, #tpu.memory_space<vmem>>, vector<1x16x14xf32>
    %79 = vector.shape_cast %78 : vector<1x16x14xf32> to vector<16x14xf32>
    %80 = vector.shape_cast %77 : vector<16x14xf32> to vector<1x16x14xf32>
    tpu.vector_store %arg4[%c0_6, %c0_7, %c0_8], %80 {strides = array<i32>} : memref<1x16x14xf32, #tpu.memory_space<vmem>>, vector<1x16x14xf32>,
    return
  }
  func.func @transform_0(%arg0: i32) -> (i32, i32, i32) {
    %c0_i32 = arith.constant 0 : i32
    %c0_i32_0 = arith.constant 0 : i32
    %c0_i32_1 = arith.constant 0 : i32
    return %arg0, %c0_i32, %c0_i32_0 : i32, i32, i32
  }
  func.func @transform_1(%arg0: i32) -> (i32, i32) {
    %c0_i32 = arith.constant 0 : i32
    %c0_i32_0 = arith.constant 0 : i32
    %c0_i32_1 = arith.constant 0 : i32
    return %c0_i32, %c0_i32_0 : i32, i32
  }
  func.func @transform_2(%arg0: i32) -> (i32, i32) {
    %c0_i32 = arith.constant 0 : i32
    %c0_i32_0 = arith.constant 0 : i32
    %c0_i32_1 = arith.constant 0 : i32
    return %c0_i32, %c0_i32_0 : i32, i32
  }
  func.func @transform_3(%arg0: i32) -> (i32, i32, i32) {
    %c0_i32 = arith.constant 0 : i32
    %c0_i32_0 = arith.constant 0 : i32
    %c0_i32_1 = arith.constant 0 : i32
    return %arg0, %c0_i32, %c0_i32_0 : i32, i32, i32
  }
}

</mosaic_0001>

<bundles_post_ra>
// kernel: tpu_custom_call.1
= control target key start
LH: loop header
LB: loop body
LE: loop exit
PB: predicated region body
PF: predicated region fallthrough
CT: control target
= control target key end

     0   :  { %8 = vsyncpa [#allocation3], 0  ;;  %s858_s0 = inlined_call_operand.hbm [shape: f32[2,4,16], index: 0, kind: input, shape index: {}]   ;;  %s859_s1 = inlined_call_operand.vmem [shape: f32[16,12], index: 1, kind: input, shape index: {}]   ;;  %s860_s2 = inlined_call_operand.vmem [shape: f32[16,1], index: 2, kind: input, shape index: {}]   ;;  %s861_s3 = inlined_call_operand.vmem [shape: f32[2,16,14], index: 3, kind: output, shape index: {}]  }
   0x1   :  { %10 = vsyncpa [#allocation3 + $0x1], 0  ;;  %s686_s12 = smov 0   ;;  %s688_s13 = smov 0  }
   0x2   :  { %s690_s14 = smov 0   ;;  %s692_s15 = smov 0  }
   0x3 LB: > { %s705_s16 = sadd.s32 4294967295, %s649_s15   ;;  %s708_s17 = sadd.s32 1, %s649_s15   ;;  %s649_s15 = sphi %s692_s15, %s869_s15   ;;  %s645_s14 = sphi %s690_s14, %s868_s14   ;;  %s641_s13 = sphi %s688_s13, %s867_s13   ;;  %s637_s12 = sphi %s686_s12, %s866_s12  }
   0x4   : > { %s20_s18 = ssub.s32 %s649_s15, %s708_s17  ;;  %s23_s19 = sadd.s32 1, %s645_s14 }
   0x5   : > { %p21_p0 = scmp.eq.s32.totalorder %s20_s18, 0  ;;  %p30_p1 = scmp.ne.s32.totalorder %s645_s14, %s641_s13 }
   0x6   : > { %p31_p2 = scmp.eq.s32.totalorder %s649_s15, 0  ;;  %p36_p3 = scmp.ne.s32.totalorder %s641_s13, %s637_s12 }
   0x7   : > { %s718_s20 = scalar_select %p21_p0, %s645_s14, %s23_s19  }
   0x8   : > { %p32_p4 = por %p31_p2, %p30_p1  ;;  %p37_p5 = scmp.eq.s32.totalorder %s705_s16, 0 }
   0x9   : > { %p517_p6 = scmp.lt.s32.totalorder %s649_s15, 2  ;;  %s134_s22 = sand.u32 1, %s645_s14  }
   0xa   : > { %p722_p7 = por %p37_p5, %p36_p3  ;;  %s502_s23 = sshll.u32 %s134_s22, 2 }
   0xb   : > { %s503_s24 = sshll.u32 %s649_s15, 6  ;;  %s138_s28 = scalar_lea.vmem [#allocation2], %s502_s23 }
   0xc   : > { %s731_s27 = scalar_lea.hbm %s858_s0, %s503_s24  ;;  %s145_s29 = sshll.u32 %s138_s28, 4  ;;  %s733_s29 = int_to_ptr.vmem [resolvable:$true] %s145_s29 }
   0xd   : > { %p735_p8 = pnand %p517_p6, %p32_p4  ;;  %s135_s4 = scalar_lea.sflag [#allocation3], %s134_s22 }
   0xe   : > { %s585_s5 = scalar_lea.hbm %s731_s27, 64  ;;  %s590_s8 = scalar_lea.hbm %s858_s0, 128 }
   0xf   : > { %p586_p11 = scmp.ne.s32.totalorder %s731_s27, %s585_s5  ;;  %p587_p12 = pneg %p735_p8 }
  0x10   : > { %p591_p1 = scmp.lt.u32.totalorder %s731_s27, %s858_s0  ;;  %p592_p2 = scmp.lt.u32.totalorder %s590_s8, %s585_s5 }
  0x11   : > { %p588_p13 = pnand %p587_p12, %p586_p11  ;;  %p594_p4 = scmp.lt.u32.totalorder %s585_s5, %s731_s27 }
  0x12   : > { %p593_p3 = por %p592_p2, %p591_p1 }
  0x13   : > { %p589_p0 = pneg %p588_p13 }
  0x14   : > { %p595_p5 = por %p594_p4, %p593_p3 }
  0x16   : > { %p596_p6 = pnand %p595_p5, %p589_p0 }
  0x18   : > { %599 = shalt.err (!%p596_p6)
}
  0x19   : > { %s600_s11 = scalar_lea.vmem %s733_s29, 64  ;;  %s651_s12 = smov [#allocation2]  }
  0x1a   : > { %p601_p11 = scmp.ne.s32.totalorder %s733_s29, %s600_s11  ;;  %s605_s18 = sshll.u32 %s651_s12, 4  ;;  %s606_s18 = int_to_ptr.vmem [resolvable:$false] %s605_s18 }
  0x1b   : > { %s607_s19 = scalar_lea.vmem %s606_s18, 128  ;;  %p608_p10 = scmp.lt.s32.totalorder %s733_s29, %s606_s18 }
  0x1c   : > { %p603_p13 = pnand %p601_p11, %p587_p12  ;;  %p609_p1 = scmp.lt.s32.totalorder %s607_s19, %s600_s11 }
  0x1e   : > { %p604_p9 = pneg %p603_p13  ;;  %p610_p2 = por %p609_p1, %p608_p10 }
  0x20   : > { %p611_p3 = pnand %p610_p2, %p604_p9 }
  0x22   : > { %614 = shalt.err (!%p611_p3)
}
  0x23   : > { %516 = dma.hbm_to_vmem [thread:$0]  (!%p735_p8), %s731_s27, 64, %s733_s29, %s135_s4  }
  0x24   : > { %p864_p0 = scmp.lt.s32.totalorder %s649_s15, 3  ;;  %p865_p4 = scmp.ge.s32.totalorder %s649_s15, 1 }
  0x26   : > { %p151_p12 = pnand %p865_p4, %p864_p0 }
  0x27   : > { %s156_s22 = sand.u32 (!%p151_p12), 1, %s641_s13  }
  0x28   : > { %154 = sbr.rel (%p151_p12) target bundleno = 340 (0x154), region = 32  ;;  %s771_s23 = sshll.u32 (!%p151_p12), %s156_s22, 2 }
  0x29   : > { %s157_s24 = scalar_lea.sflag (!%p151_p12), [#allocation3], %s156_s22  ;;  %s160_s25 = scalar_lea.vmem (!%p151_p12), [#allocation2], %s771_s23 }
  0x2f   : > { %632 = dma.done.wait (%p722_p7), %s157_s24, 64  }
  0x30   : > { %634 = vsyncadd (%p722_p7), %s157_s24, 4294967232  ;;  %v652_v0 = vmov 2   ;;  %v653_v1 = vmov 1   ;;  %v189_v2 = vld [vmem:[%s859_s1] sm:$0xff]  ;;  %v190_v3 = vld [vmem:[%s859_s1 + $0x8] sm:$0xff]  ;;  %v654_v4 = vmov 4   ;;  %v213_v16 = vlaneseq }
  0x31   : > { %565 = vset.pattern.permute.xlu1 %v652_v0  ;;  %564 = vset.pattern.permute.xlu0 %v653_v1  ;;  %v655_v5 = vmov 5   ;;  %v656_v6 = vmov 7   ;;  %v657_v7 = vmov 8   ;;  %v658_v8 = vmov 10   ;;  %v192_v10 = vld [vmem:[%s860_s2 + $0x8] sm:$0xff]  ;;  %v191_v15 = vld [vmem:[%s860_s2] sm:$0xff] }
  0x32   : > { %242 = vperm.xlu1 %565, %v189_v2   ;;  %222 = vperm.xlu0 %564, %v189_v2   ;;  %v659_v9 = vmov 0   ;;  %v660_v11 = vmov 11   ;;  %v661_v12 = vmov 3   ;;  %v662_v13 = vmov 6   ;;  %v188_v19 = vld [vmem:[%s160_s25] sm:$0xf] }
  0x33   : > { %v663_v14 = vmov 9   ;;  %v214_v17 = vshrl.u32 %v213_v16, 7  ;;  %s664_s5 = smov 127   ;;  %s665_s6 = smov 126   ;;  %vm429_vm0 = vcmask 113664  }
  0x34   : > { %p183_p7 = scmp.lt.s32.totalorder %s705_s16, 1 }
  0x35   : > { %v215_v18 = vsub.s32 0, %v214_v17  ;;  %v271_v24 = vsub.s32 1, %v214_v17  ;;  %v327_v35 = vsub.s32 2, %v214_v17  ;;  %v383_v46 = vsub.s32 3, %v214_v17 }
  0x36   : > { %246 = vperm.xlu1 %565, %v190_v3   ;;  %226 = vperm.xlu0 %564, %v190_v3   ;;  %s871_s16 = smov (!%p183_p7, %s705_s16), 1 }
  0x37   : > { %v792_v20 = vrot.slane %v188_v19, %v215_v18  ;;  %v798_v29 = vrot.slane %v188_v19, %v271_v24  ;;  %v808_v38 = vrot.slane %v188_v19, %v327_v35  ;;  %v820_v48 = vrot.slane %v188_v19, %v383_v46  ;;  %s510_s7 = sshll.u32 %s871_s16, 4 }
  0x38   : > { %s187_s10 = scalar_lea.vmem %s861_s3, %s510_s7 }
  0x3a   : > { %567 = vset.pattern.permute.xlu1 %v654_v4  ;;  %566 = vset.pattern.permute.xlu0 %v654_v4 }
  0x3b   : > { %282 = vperm.xlu1 %567, %v190_v3   ;;  %278 = vperm.xlu0 %566, %v189_v2  }
  0x3f   : > { %568 = vset.pattern.permute.xlu1 %v655_v5  ;;  %569 = vset.pattern.permute.xlu0 %v655_v5 }
  0x40   : > { %298 = vperm.xlu1 %568, %v189_v2   ;;  %302 = vperm.xlu0 %569, %v190_v3  }
  0x44   : > { %570 = vset.pattern.permute.xlu1 %v656_v6  ;;  %571 = vset.pattern.permute.xlu0 %v657_v7 }
  0x45   : > { %334 = vperm.xlu1 %570, %v189_v2   ;;  %354 = vperm.xlu0 %571, %v189_v2  }
  0x49   : > { %338 = vperm.xlu1 %570, %v190_v3   ;;  %574 = vset.pattern.permute.xlu0 %v658_v8 }
  0x4a   : > { %394 = vperm.xlu0 %574, %v190_v3  }
  0x4d   : > { %572 = vset.pattern.permute.xlu1 %v657_v7 }
  0x4e   : > { %358 = vperm.xlu1 %572, %v190_v3   ;;  %576 = vset.pattern.permute.xlu0 %v659_v9 }
  0x4f   : > { %205 = vperm.xlu0 %576, %v189_v2  }
  0x52   : > { %573 = vset.pattern.permute.xlu1 %v658_v8 }
  0x53   : > { %390 = vperm.xlu1 %573, %v189_v2   ;;  %200 = vperm.xlu0 %576, %v192_v10  }
  0x57   : > { %575 = vset.pattern.permute.xlu1 %v660_v11  ;;  %579 = vset.pattern.permute.xlu0 %v661_v12 }
  0x58   : > { %410 = vperm.xlu1 %575, %v189_v2   ;;  %266 = vperm.xlu0 %579, %v190_v3  }
  0x5c   : > { %414 = vperm.xlu1 %575, %v190_v3   ;;  %580 = vset.pattern.permute.xlu0 %v662_v13 }
  0x5d   : > { %318 = vperm.xlu0 %580, %v189_v2  }
  0x60   : > { %577 = vset.pattern.permute.xlu1 %v659_v9 }
  0x61   : > { %210 = vperm.xlu1 %577, %v190_v3   ;;  %583 = vset.pattern.permute.xlu0 %v663_v14 }
  0x62   : > { %378 = vperm.xlu0 %583, %v190_v3  }
  0x65   : > { %195 = vperm.xlu1 %577, %v191_v15  }
  0x66   : > { %584 = vset.pattern.permute.xlu0 %v660_v11 }
  0x69   : > { %578 = vset.pattern.permute.xlu1 %v661_v12 }
  0x6a   : > { %262 = vperm.xlu1 %578, %v189_v2  }
  0x6e   : > { %581 = vset.pattern.permute.xlu1 %v662_v13 }
  0x6f   : > { %322 = vperm.xlu1 %581, %v190_v3  }
  0x73   : > { %582 = vset.pattern.permute.xlu1 %v663_v14 }
  0x74   : > { %374 = vperm.xlu1 %582, %v189_v2  }
  0xb1   : > { %v243_v21 = vpop.permute.xlu1 %242  ;;  %v223_v22 = vpop.permute.xlu0 %222 }
  0xb2   : > { %v229_v23 = vmul.f32 %v223_v22, %v792_v20  ;;  %v249_v30 = vmul.f32 %v243_v21, %v792_v20 }
  0xb4   : > { %233 = vrot.lane.b32.xlu1 %v229_v23, %s664_s5 }
  0xb5   : > { %v247_v25 = vpop.permute.xlu1 %246  ;;  %v227_v26 = vpop.permute.xlu0 %226 }
  0xb6   : > { %v250_v27 = vmul.f32 %v247_v25, %v792_v20  ;;  %v230_v28 = vmul.f32 %v227_v26, %v792_v20 }
  0xb8   : > { %255 = vrot.lane.b32.xlu0 %v250_v27, %s665_s6  ;;  %235 = vrot.lane.b32.xlu1 %v230_v28, %s664_s5 }
  0xba   : > { %v283_v31 = vpop.permute.xlu1 %282  ;;  %v279_v32 = vpop.permute.xlu0 %278 }
  0xbb   : > { %v286_v33 = vmul.f32 %v283_v31, %v798_v29  ;;  %v285_v34 = vmul.f32 %v279_v32, %v798_v29 }
  0xbc   : > { %253 = vrot.lane.b32.xlu1 %v249_v30, %s665_s6 }
  0xbd   : > { %291 = vrot.lane.b32.xlu0 %v286_v33, %s664_s5 }
  0xbf   : > { %v299_v36 = vpop.permute.xlu1 %298  ;;  %v303_v37 = vpop.permute.xlu0 %302 }
  0xc0   : > { %289 = vrot.lane.b32.xlu1 %v285_v34, %s664_s5  ;;  %v305_v39 = vmul.f32 %v299_v36, %v798_v29  ;;  %v306_v41 = vmul.f32 %v303_v37, %v798_v29 }
  0xc4   : > { %v335_v40 = vpop.permute.xlu1 %334  ;;  %309 = vrot.lane.b32.xlu1 %v305_v39, %s665_s6  ;;  %v355_v42 = vpop.permute.xlu0 %354 }
  0xc5   : > { %v341_v43 = vmul.f32 %v335_v40, %v808_v38  ;;  %v361_v44 = vmul.f32 %v355_v42, %v808_v38 }
  0xc7   : > { %345 = vrot.lane.b32.xlu0 %v341_v43, %s664_s5 }
  0xc8   : > { %v339_v45 = vpop.permute.xlu1 %338  ;;  %311 = vrot.lane.b32.xlu1 %v306_v41, %s665_s6 }
  0xc9   : > { %v342_v47 = vmul.f32 %v339_v45, %v808_v38  ;;  %v395_v50 = vpop.permute.xlu0 %394 }
  0xca   : > { %v398_v52 = vmul.f32 %v395_v50, %v820_v48 }
  0xcb   : > { %365 = vrot.lane.b32.xlu0 %v361_v44, %s665_s6 }
  0xcc   : > { %347 = vrot.lane.b32.xlu1 %v342_v47, %s664_s5 }
  0xcd   : > { %v359_v49 = vpop.permute.xlu1 %358 }
  0xce   : > { %v362_v51 = vmul.f32 %v359_v49, %v808_v38  ;;  %v206_v61 = vpop.permute.xlu0 %205 }
  0xcf   : > { %v217_v7 = vmul.f32 %v792_v20, %v206_v61 }
  0xd0   : > { %367 = vrot.lane.b32.xlu1 %v362_v51, %s665_s6 }
  0xd2   : > { %v391_v53 = vpop.permute.xlu1 %390  ;;  %v201_v63 = vpop.permute.xlu0 %200 }
  0xd3   : > { %v397_v54 = vmul.f32 %v391_v53, %v820_v48 }
  0xd4   : > { %403 = vrot.lane.b32.xlu1 %v398_v52, %s664_s5 }
  0xd5   : > { %401 = vrot.lane.b32.xlu0 %v397_v54, %s664_s5 }
  0xd7   : > { %v411_v55 = vpop.permute.xlu1 %410  ;;  %v267_v1 = vpop.permute.xlu0 %266 }
  0xd8   : > { %v417_v56 = vmul.f32 %v411_v55, %v820_v48  ;;  %v274_v11 = vmul.f32 %v798_v29, %v267_v1 }
  0xda   : > { %421 = vrot.lane.b32.xlu0 %v417_v56, %s665_s6 }
  0xdb   : > { %v415_v57 = vpop.permute.xlu1 %414 }
  0xdc   : > { %v418_v58 = vmul.f32 %v415_v57, %v820_v48  ;;  %v319_v3 = vpop.permute.xlu0 %318 }
  0xde   : > { %423 = vrot.lane.b32.xlu1 %v418_v58, %s665_s6 }
  0xe0   : > { %v211_v59 = vpop.permute.xlu1 %210 }
  0xe1   : > { %v218_v4 = vmul.f32 %v792_v20, %v211_v59  ;;  %v379_v5 = vpop.permute.xlu0 %378  ;;  %v329_v20 = vmul.f32 %v808_v38, %v319_v3 }
  0xe2   : > { %v386_v43 = vmul.f32 %v820_v48, %v379_v5 }
  0xe3   : > { %v220_v8 = vadd.f32 %v218_v4, %v201_v63 }
  0xe4   : > { %v196_v60 = vpop.permute.xlu1 %195 }
  0xe5   : > { %v219_v10 = vadd.f32 %v217_v7, %v196_v60 }
  0xe9   : > { %v263_v62 = vpop.permute.xlu1 %262 }
  0xea   : > { %v273_v17 = vmul.f32 %v798_v29, %v263_v62 }
  0xee   : > { %v323_v0 = vpop.permute.xlu1 %322 }
  0xef   : > { %v330_v32 = vmul.f32 %v808_v38, %v323_v0 }
  0xf3   : > { %v375_v2 = vpop.permute.xlu1 %374 }
  0xf4   : > { %v385_v36 = vmul.f32 %v820_v48, %v375_v2 }
 0x126   : > { %v234_v6 = vpop.permute.xlu1 %233 }
 0x127   : > { %v239_v14 = vadd.f32 %v234_v6, %v219_v10 }
 0x12a   : > { %v236_v9 = vpop.permute.xlu1 %235  ;;  %v256_v13 = vpop.permute.xlu0 %255 }
 0x12b   : > { %v240_v12 = vadd.f32 %v236_v9, %v220_v8 }
 0x12d   : > { %v260_v15 = vadd.f32 %v256_v13, %v240_v12 }
 0x12e   : > { %v254_v16 = vpop.permute.xlu1 %253 }
 0x12f   : > { %v259_v18 = vadd.f32 %v254_v16, %v239_v14  ;;  %v276_v19 = vadd.f32 %v274_v11, %v260_v15  ;;  %v292_v23 = vpop.permute.xlu0 %291 }
 0x131   : > { %v275_v21 = vadd.f32 %v273_v17, %v259_v18  ;;  %v296_v27 = vadd.f32 %v292_v23, %v276_v19 }
 0x132   : > { %v290_v22 = vpop.permute.xlu1 %289 }
 0x133   : > { %v295_v24 = vadd.f32 %v290_v22, %v275_v21 }
 0x136   : > { %v310_v25 = vpop.permute.xlu1 %309 }
 0x137   : > { %v315_v26 = vadd.f32 %v310_v25, %v295_v24 }
 0x139   : > { %v346_v28 = vpop.permute.xlu0 %345  ;;  %v331_v30 = vadd.f32 %v329_v20, %v315_v26 }
 0x13a   : > { %v312_v31 = vpop.permute.xlu1 %311 }
 0x13b   : > { %v351_v33 = vadd.f32 %v346_v28, %v331_v30  ;;  %v316_v29 = vadd.f32 %v312_v31, %v296_v27 }
 0x13d   : > { %v366_v34 = vpop.permute.xlu0 %365  ;;  %v332_v35 = vadd.f32 %v330_v32, %v316_v29 }
 0x13e   : > { %v371_v37 = vadd.f32 %v366_v34, %v351_v33  ;;  %v348_v39 = vpop.permute.xlu1 %347 }
 0x13f   : > { %v352_v41 = vadd.f32 %v348_v39, %v332_v35 }
 0x140   : > { %v387_v40 = vadd.f32 %v385_v36, %v371_v37 }
 0x142   : > { %v368_v42 = vpop.permute.xlu1 %367 }
 0x143   : > { %v372_v44 = vadd.f32 %v368_v42, %v352_v41 }
 0x145   : > { %v388_v45 = vadd.f32 %v386_v43, %v372_v44 }
 0x146   : > { %v404_v47 = vpop.permute.xlu1 %403 }
 0x147   : > { %v402_v46 = vpop.permute.xlu0 %401  ;;  %v408_v51 = vadd.f32 %v404_v47, %v388_v45 }
 0x148   : > { %v407_v38 = vadd.f32 %v402_v46, %v387_v40 }
 0x14c   : > { %v422_v49 = vpop.permute.xlu0 %421 }
 0x14d   : > { %v427_v50 = vadd.f32 %v422_v49, %v407_v38 }
 0x14f   : > { %430 = vst.msk [vmem:[%s187_s10] sm:$0xff] %vm429_vm0, %v427_v50 }
 0x150   : > { %v424_v52 = vpop.permute.xlu1 %423 }
 0x151   : > { %v428_v53 = vadd.f32 %v424_v52, %v408_v51 }
 0x153   : > { %431 = vst.msk [vmem:[%s187_s10 + $0x8] sm:$0xff] %vm429_vm0, %v428_v53 }
 0x154 PF: > { %p13_p8 = scmp.ge.s32.totalorder %s708_s17, 4   ;;  %s866_s12 = smov %s641_s13 }
 0x155   : > { %s867_s13 = smov %s645_s14  ;;  %s868_s14 = smov %s718_s20 }
 0x156   : > { %s869_s15 = smov %s708_s17  ;;  %15 = sbr.rel (!%p13_p8) target bundleno = 3 (0x3), region = 72 }
 0x15d   :  { %453 = vsyncpa [#allocation3], 1 }
 0x15e   :  { %455 = vsyncpa [#allocation3 + $0x1], 1 }

</bundles_post_ra>
